<compile_context>
chip_gen: v5e
topology: v5e:2x2
jax: 0.10.0
libtpu: 0.0.40
codegen_flags: <defaults>
</compile_context>

<pallas_src>
import math
from functools import partial

import jax
import jax.numpy as jnp
from jax.experimental import pallas as pl
from jax.experimental.pallas import tpu as pltpu


# ------------------------------ kernel ------------------------------------- #

def _fused_attention_fc_kernel(x_ref, wq_ref, bq_ref, wk_ref, wv_ref,
                               mask_ref, bd_ref, wf_ref, bf_ref, o_ref, *, heads):
    """Fused MHA + Flatten + Linear + ReLU (out_proj folded into fc).

    x_ref   : (N, H*L, E)     batch-major input, tiled `heads` times along rows
    wq_ref  : (E, E)          Wq^T, pre-scaled by 1/sqrt(dh)
    bq_ref  : (1, E)          bq,   pre-scaled by 1/sqrt(dh)
    wk_ref  : (E, E)          Wk^T   (bk dropped: softmax-invariant)
    wv_ref  : (E, E)          Wv^T   (bv folded into bf on the host)
    mask_ref: (H*L, E)        head mask: row h*L+m keeps only head-h lanes of E
    bd_ref  : (H*L, H*L)      block-diagonal ones: per-head softmax denominator
    wf_ref  : (N, E, OUT_PAD) Wo^T @ fc-weight slice per batch, lane-padded
    bf_ref  : (1, OUT_PAD)    fused bias (b_fc + (bo + bv Wo^T) terms), padded
    o_ref   : (L, OUT_PAD)    relu(fc(flatten(attn)))  lane-dense, zero-padded
    """
    N, P, E = x_ref.shape
    L = P // heads

    x_all = x_ref[...]                                               # (N, P, E)
    x2 = x_all.reshape(N * P, E)                                     # (N*P, E)
    xq2 = x_all[:, 0:L, :].reshape(N * L, E)                         # (N*L, E)

    # Projections: three separate lane-0 matmuls (no packed-QKV lane slicing).
    q = (jnp.dot(xq2, wq_ref[...], preferred_element_type=jnp.float32)
         + bq_ref[...]).reshape(N, L, E)                             # pre-scaled
    mask = mask_ref[...]                                             # (P, E)
    kc = jnp.dot(x2, wk_ref[...],
                 preferred_element_type=jnp.float32).reshape(N, P, E) * mask
    vc = jnp.dot(x2, wv_ref[...],
                 preferred_element_type=jnp.float32).reshape(N, P, E) * mask

    # All-head scores in one batched matmul; lane p encodes (head, key pos).
    s = jnp.einsum('nle,npe->nlp', q, kc,
                   preferred_element_type=jnp.float32)               # (N, L, H*L)
    # Per-head softmax: subtracting the global per-(n,l) max (constant over
    # every head's key axis) is exact; the per-head segmented denominator is
    # produced (and broadcast back to its 8-lane group) by one block-diagonal
    # ones matmul instead of a cross-lane segmented reduction.
    s = s - jnp.max(s, axis=-1, keepdims=True)
    es = jnp.exp(s)
    denom = jnp.dot(es.reshape(N * L, P), bd_ref[...],
                    preferred_element_type=jnp.float32).reshape(N, L, P)
    # ~1e-4 relative error; switch to approx=False if feeding tighter tolerances.
    p = es * pl.reciprocal(denom, approx=True)

    # Context in the original concat-head layout: vc is head-masked, so the
    # sum over all H*L lanes lands each head in its own dh-slice of E.
    ctx = jnp.einsum('nlp,npe->nle', p, vc,
                     preferred_element_type=jnp.float32)             # (N, L, E)

    # Flatten + Linear (+ folded out_proj) + ReLU: accumulate plain 2-D dots,
    # no (N, L, OUT_PAD) intermediate and no cross-tile sum.
    y = bf_ref[...]                                                  # (1, OUT_PAD)
    for n in range(N):                                               # static, N=6
        y = y + jnp.dot(ctx[n], wf_ref[n], preferred_element_type=jnp.float32)
    o_ref[...] = jnp.maximum(y, 0.0)


# --------------------------- parameter prep -------------------------------- #

def prepare_params(params, heads, out_pad):
    """One-time host-side packing: scale Wq, fold Wo/bo/bv into fc, lane-pad."""
    E = params["wq"].shape[0]
    dh = E // heads
    out_size, fc_in = params["w_fc"].shape
    N = fc_in // E
    scale = 1.0 / math.sqrt(dh)

    wq_t = params["wq"].T * scale                                    # (E, E)
    bq = (params["bq"] * scale).reshape(1, E)
    wk_t = params["wk"].T                                            # bk dropped (exact)
    wv_t = params["wv"].T                                            # bv folded below (exact)

    # fc weight (out, N*E) -> per-batch slices (N, E, out), fold out_proj.
    w_fc_r = params["w_fc"].reshape(out_size, N, E).transpose(1, 2, 0)   # (N, E, out)
    w_fused = jnp.matmul(params["wo"].T, w_fc_r)                         # (N, E, out)
    w_fused = jnp.pad(w_fused, ((0, 0), (0, 0), (0, out_pad - out_size)))

    # bias terms from out_proj bias and the value bias (P rows sum to 1).
    c = params["bv"] @ params["wo"].T + params["bo"]                     # (E,)
    b_fused = params["b_fc"] + jnp.einsum('e,neo->o', c, w_fc_r)         # (out,)
    b_fused = jnp.pad(b_fused, (0, out_pad - out_size)).reshape(1, out_pad)

    return {"wq_t": wq_t, "bq": bq, "wk_t": wk_t, "wv_t": wv_t,
            "w_fc": w_fused, "b_fc": b_fused}


# ------------------------------ forward ------------------------------------ #

def _full_spec(shape):
    return pl.BlockSpec(shape, lambda i: (0,) * len(shape))


@partial(jax.jit, static_argnums=(2, 3))
def hrt_self_attention_forward(x, prep, heads, out_size):
    L, N, E = x.shape
    dh = E // heads
    P = heads * L
    out_pad = prep["b_fc"].shape[1]

    # Tiny layout prep fused into the jitted program (outside the kernel):
    # batch-major x, tiled `heads` times along rows, so per-head masking needs
    # no sub-tile lane slices inside the kernel.
    x_nle = jnp.transpose(x, (1, 0, 2))                              # (N, L, E)
    x_tiled = jnp.tile(x_nle, (1, heads, 1))                         # (N, H*L, E)

    # Constants (constant-folded under jit): head mask + block-diagonal ones.
    row_head = jnp.arange(P, dtype=jnp.int32) // L                   # (H*L,)
    lane_head = jnp.arange(E, dtype=jnp.int32) // dh                 # (E,)
    head_mask = (row_head[:, None] == lane_head[None, :]).astype(jnp.float32)
    block_diag = (row_head[:, None] == row_head[None, :]).astype(jnp.float32)

    # NOTE: if this module is invoked many times per step, batch the calls
    # along a leading "parallel" grid axis (uses both TCs on v7x); a single
    # invocation stays at grid=(1,).
    y_pad = pl.pallas_call(
        partial(_fused_attention_fc_kernel, heads=heads),
        out_shape=jax.ShapeDtypeStruct((L, out_pad), jnp.float32),
        grid=(1,),
        in_specs=[
            _full_spec((N, P, E)),          # x (batch-major, head-tiled rows)
            _full_spec((E, E)),             # Wq^T (pre-scaled)
            _full_spec((1, E)),             # bq   (pre-scaled)
            _full_spec((E, E)),             # Wk^T
            _full_spec((E, E)),             # Wv^T
            _full_spec((P, E)),             # head mask
            _full_spec((P, P)),             # block-diagonal ones
            _full_spec((N, E, out_pad)),    # fused fc weight (lane-padded)
            _full_spec((1, out_pad)),       # fused fc bias   (lane-padded)
        ],
        out_specs=_full_spec((L, out_pad)),
        compiler_params=pltpu.CompilerParams(dimension_semantics=("arbitrary",)),
    )(x_tiled, prep["wq_t"], prep["bq"], prep["wk_t"], prep["wv_t"],
      head_mask, block_diag, prep["w_fc"], prep["b_fc"])
    return y_pad[:, :out_size]


# ------------------------- pure-JAX reference ------------------------------ #

def _reference(x, params, heads):
    L, N, E = x.shape
    dh = E // heads
    q = x @ params["wq"].T + params["bq"]
    k = x @ params["wk"].T + params["bk"]
    v = x @ params["wv"].T + params["bv"]
    q = q.reshape(L, N, heads, dh)
    k = k.reshape(L, N, heads, dh)
    v = v.reshape(L, N, heads, dh)
    s = jnp.einsum("lnhd,mnhd->nhlm", q, k) / math.sqrt(dh)
    p = jax.nn.softmax(s, axis=-1)
    ctx = jnp.einsum("nhlm,mnhd->lnhd", p, v).reshape(L, N, E)
    attn = ctx @ params["wo"].T + params["bo"]
    flat = attn.reshape(L, N * E)
    return jax.nn.relu(flat @ params["w_fc"].T + params["b_fc"])


# ------------------------------- main -------------------------------------- #

if __name__ == "__main__":
    # Module hyperparameters (small but mutually consistent):
    embed_size = 16
    heads = 4
    CONFIG_LENGTH = 2                      # CONFIG.LENGTH
    output_size = 32
    seq_len = 8                            # L
    batch = 3 * CONFIG_LENGTH              # N, so N*E == CONFIG.LENGTH*3*embed_size

    key = jax.random.PRNGKey(0)
    ks = jax.random.split(key, 8)
    fc_in = CONFIG_LENGTH * 3 * embed_size

    params = {
        # nn.MultiheadAttention in_proj (split into q/k/v) and out_proj
        "wq":   0.1 * jax.random.normal(ks[0], (embed_size, embed_size), jnp.float32),
        "wk":   0.1 * jax.random.normal(ks[1], (embed_size, embed_size), jnp.float32),
        "wv":   0.1 * jax.random.normal(ks[2], (embed_size, embed_size), jnp.float32),
        "bq":   0.05 * jax.random.normal(ks[3], (embed_size,), jnp.float32),
        "bk":   jnp.zeros((embed_size,), jnp.float32),
        "bv":   0.05 * jax.random.normal(ks[4], (embed_size,), jnp.float32),
        "wo":   0.1 * jax.random.normal(ks[5], (embed_size, embed_size), jnp.float32),
        "bo":   0.05 * jnp.ones((embed_size,), jnp.float32),
        # nn.Linear(CONFIG.LENGTH * 3 * embed_size, output_size)
        "w_fc": 0.1 * jax.random.normal(ks[6], (output_size, fc_in), jnp.float32),
        "b_fc": 0.05 * jax.random.normal(ks[7], (output_size,), jnp.float32),
    }

    x = jax.random.normal(key, (seq_len, batch, embed_size), jnp.float32)

    out_pad = ((output_size + 127) // 128) * 128       # lane-dense fc output width
    prep = prepare_params(params, heads, out_pad)      # one-time weight preparation

    out = hrt_self_attention_forward(x, prep, heads, output_size)
    out = jax.block_until_ready(out)

    ref = jax.block_until_ready(_reference(x, params, heads))
    assert out.shape == (seq_len, output_size), out.shape
    assert jnp.allclose(out, ref, atol=1e-2, rtol=1e-2), float(jnp.max(jnp.abs(out - ref)))

    print("KERNEL_OK")
</pallas_src>

<mosaic_0001>
module attributes {stable_mosaic.version = 11 : i64} {
  func.func @_fused_attention_fc_kernel(%arg0: i32, %arg1: memref<6x32x16xf32, #tpu.memory_space<vmem>>, %arg2: memref<16x16xf32, #tpu.memory_space<vmem>>, %arg3: memref<1x16xf32, #tpu.memory_space<vmem>>, %arg4: memref<16x16xf32, #tpu.memory_space<vmem>>, %arg5: memref<16x16xf32, #tpu.memory_space<vmem>>, %arg6: memref<32x16xf32, #tpu.memory_space<vmem>>, %arg7: memref<32x32xf32, #tpu.memory_space<vmem>>, %arg8: memref<6x16x128xf32, #tpu.memory_space<vmem>>, %arg9: memref<1x128xf32, #tpu.memory_space<vmem>>, %arg10: memref<8x128xf32, #tpu.memory_space<vmem>>) attributes {dimension_semantics = [#tpu.dimension_semantics<arbitrary>], iteration_bounds = array<i64: 1>, scalar_prefetch = 0 : i64, scratch_operands = 0 : i64, tpu.core_type = #tpu.core_type<tc>, window_params = [{pipeline_mode = #tpu.pipeline_mode<synchronous>, transform_indices = @transform_0, window_bounds = array<i64: 6, 32, 16>}, {pipeline_mode = #tpu.pipeline_mode<synchronous>, transform_indices = @transform_1, window_bounds = array<i64: 16, 16>}, {pipeline_mode = #tpu.pipeline_mode<synchronous>, transform_indices = @transform_2, window_bounds = array<i64: 1, 16>}, {pipeline_mode = #tpu.pipeline_mode<synchronous>, transform_indices = @transform_3, window_bounds = array<i64: 16, 16>}, {pipeline_mode = #tpu.pipeline_mode<synchronous>, transform_indices = @transform_4, window_bounds = array<i64: 16, 16>}, {pipeline_mode = #tpu.pipeline_mode<synchronous>, transform_indices = @transform_5, window_bounds = array<i64: 32, 16>}, {pipeline_mode = #tpu.pipeline_mode<synchronous>, transform_indices = @transform_6, window_bounds = array<i64: 32, 32>}, {pipeline_mode = #tpu.pipeline_mode<synchronous>, transform_indices = @transform_7, window_bounds = array<i64: 6, 16, 128>}, {pipeline_mode = #tpu.pipeline_mode<synchronous>, transform_indices = @transform_8, window_bounds = array<i64: 1, 128>}, {pipeline_mode = #tpu.pipeline_mode<synchronous>, transform_indices = @transform_9, window_bounds = array<i64: 8, 128>}]} {
    %c0 = arith.constant 0 : index
    %c0_0 = arith.constant 0 : index
    %c0_1 = arith.constant 0 : index
    %0 = vector.load %arg1[%c0, %c0_0, %c0_1] : memref<6x32x16xf32, #tpu.memory_space<vmem>>, vector<6x32x16xf32>
    %1 = vector.shape_cast %0 : vector<6x32x16xf32> to vector<192x16xf32>
    %2 = vector.extract_strided_slice %0 {offsets = [0, 0, 0], sizes = [6, 8, 16], strides = [1, 1, 1]} : vector<6x32x16xf32> to vector<6x8x16xf32>
    %3 = vector.shape_cast %2 : vector<6x8x16xf32> to vector<48x16xf32>
    %c0_2 = arith.constant 0 : index
    %c0_3 = arith.constant 0 : index
    %4 = vector.load %arg2[%c0_2, %c0_3] : memref<16x16xf32, #tpu.memory_space<vmem>>, vector<16x16xf32>
    %cst = arith.constant dense<0.000000e+00> : vector<48x16xf32>
    %5 = tpu.matmul %3, %4, %cst {dimension_numbers = #tpu.dot_dimension_numbers<[1], [0], [0], [1], [0, 0, 1, 1], [], []>} : vector<48x16xf32>, vector<16x16xf32>, vector<48x16xf32> -> vector<48x16xf32>
    %c0_4 = arith.constant 0 : index
    %c0_5 = arith.constant 0 : index
    %6 = vector.load %arg3[%c0_4, %c0_5] : memref<1x16xf32, #tpu.memory_space<vmem>>, vector<1x16xf32>
    %7 = vector.broadcast %6 : vector<1x16xf32> to vector<48x16xf32>
    %8 = arith.addf %5, %7 : vector<48x16xf32>
    %9 = vector.shape_cast %8 : vector<48x16xf32> to vector<6x8x16xf32>
    %c0_6 = arith.constant 0 : index
    %c0_7 = arith.constant 0 : index
    %10 = vector.load %arg6[%c0_6, %c0_7] : memref<32x16xf32, #tpu.memory_space<vmem>>, vector<32x16xf32>
    %c0_8 = arith.constant 0 : index
    %c0_9 = arith.constant 0 : index
    %11 = vector.load %arg4[%c0_8, %c0_9] : memref<16x16xf32, #tpu.memory_space<vmem>>, vector<16x16xf32>
    %cst_10 = arith.constant dense<0.000000e+00> : vector<192x16xf32>
    %12 = tpu.matmul %1, %11, %cst_10 {dimension_numbers = #tpu.dot_dimension_numbers<[1], [0], [0], [1], [0, 0, 1, 1], [], []>} : vector<192x16xf32>, vector<16x16xf32>, vector<192x16xf32> -> vector<192x16xf32>
    %13 = vector.shape_cast %12 : vector<192x16xf32> to vector<6x32x16xf32>
    %14 = vector.shape_cast %10 : vector<32x16xf32> to vector<1x32x16xf32>
    %15 = vector.broadcast %14 : vector<1x32x16xf32> to vector<6x32x16xf32>
    %16 = arith.mulf %13, %15 : vector<6x32x16xf32>
    %c0_11 = arith.constant 0 : index
    %c0_12 = arith.constant 0 : index
    %17 = vector.load %arg5[%c0_11, %c0_12] : memref<16x16xf32, #tpu.memory_space<vmem>>, vector<16x16xf32>
    %cst_13 = arith.constant dense<0.000000e+00> : vector<192x16xf32>
    %18 = tpu.matmul %1, %17, %cst_13 {dimension_numbers = #tpu.dot_dimension_numbers<[1], [0], [0], [1], [0, 0, 1, 1], [], []>} : vector<192x16xf32>, vector<16x16xf32>, vector<192x16xf32> -> vector<192x16xf32>
    %19 = vector.shape_cast %18 : vector<192x16xf32> to vector<6x32x16xf32>
    %20 = vector.shape_cast %10 : vector<32x16xf32> to vector<1x32x16xf32>
    %21 = vector.broadcast %20 : vector<1x32x16xf32> to vector<6x32x16xf32>
    %22 = arith.mulf %19, %21 : vector<6x32x16xf32>
    "tpu.trace_start"() <{level = 10 : i32, message = "nle,npe->nlp"}> : () -> ()
    %cst_14 = arith.constant dense<0.000000e+00> : vector<6x8x32xf32>
    %23 = tpu.matmul %9, %16, %cst_14 {dimension_numbers = #tpu.dot_dimension_numbers<[2], [2], [1], [1], [0, 0, 0, 1, 1, 1], [0], [0]>} : vector<6x8x16xf32>, vector<6x32x16xf32>, vector<6x8x32xf32> -> vector<6x8x32xf32>
    "tpu.trace_stop"() : () -> ()
    %cst_15 = arith.constant dense<0xFF800000> : vector<6x8xf32>
    %24 = vector.multi_reduction <maximumf>, %23, %cst_15 [2] : vector<6x8x32xf32> to vector<6x8xf32>
    %25 = vector.shape_cast %24 : vector<6x8xf32> to vector<6x8x1xf32>
    %26 = vector.broadcast %25 : vector<6x8x1xf32> to vector<6x8x32xf32>
    %27 = arith.subf %23, %26 : vector<6x8x32xf32>
    %28 = math.exp %27 : vector<6x8x32xf32>
    %29 = vector.shape_cast %28 : vector<6x8x32xf32> to vector<48x32xf32>
    %c0_16 = arith.constant 0 : index
    %c0_17 = arith.constant 0 : index
    %30 = vector.load %arg7[%c0_16, %c0_17] : memref<32x32xf32, #tpu.memory_space<vmem>>, vector<32x32xf32>
    %cst_18 = arith.constant dense<0.000000e+00> : vector<48x32xf32>
    %31 = tpu.matmul %29, %30, %cst_18 {dimension_numbers = #tpu.dot_dimension_numbers<[1], [0], [0], [1], [0, 0, 1, 1], [], []>} : vector<48x32xf32>, vector<32x32xf32>, vector<48x32xf32> -> vector<48x32xf32>
    %32 = vector.shape_cast %31 : vector<48x32xf32> to vector<6x8x32xf32>
    %33 = tpu.reciprocal %32 {approx = true} : vector<6x8x32xf32> -> vector<6x8x32xf32>
    %34 = arith.mulf %28, %33 : vector<6x8x32xf32>
    "tpu.trace_start"() <{level = 10 : i32, message = "nlp,npe->nle"}> : () -> ()
    %cst_19 = arith.constant dense<0.000000e+00> : vector<6x8x16xf32>
    %35 = tpu.matmul %34, %22, %cst_19 {dimension_numbers = #tpu.dot_dimension_numbers<[2], [1], [1], [2], [0, 0, 0, 1, 1, 2], [0], [0]>} : vector<6x8x32xf32>, vector<6x32x16xf32>, vector<6x8x16xf32> -> vector<6x8x16xf32>
    "tpu.trace_stop"() : () -> ()
    %c0_20 = arith.constant 0 : index
    %c0_21 = arith.constant 0 : index
    %36 = vector.load %arg9[%c0_20, %c0_21] : memref<1x128xf32, #tpu.memory_space<vmem>>, vector<1x128xf32>
    %37 = vector.extract_strided_slice %35 {offsets = [0, 0, 0], sizes = [1, 8, 16], strides = [1, 1, 1]} : vector<6x8x16xf32> to vector<1x8x16xf32>
    %38 = vector.shape_cast %37 : vector<1x8x16xf32> to vector<8x16xf32>
    %c0_22 = arith.constant 0 : index
    %c0_23 = arith.constant 0 : index
    %c0_24 = arith.constant 0 : index
    %39 = vector.load %arg8[%c0_22, %c0_23, %c0_24] : memref<6x16x128xf32, #tpu.memory_space<vmem>>, vector<1x16x128xf32>
    %40 = vector.shape_cast %39 : vector<1x16x128xf32> to vector<16x128xf32>
    %cst_25 = arith.constant dense<0.000000e+00> : vector<8x128xf32>
    %41 = tpu.matmul %38, %40, %cst_25 {dimension_numbers = #tpu.dot_dimension_numbers<[1], [0], [0], [1], [0, 0, 1, 1], [], []>} : vector<8x16xf32>, vector<16x128xf32>, vector<8x128xf32> -> vector<8x128xf32>
    %42 = vector.broadcast %36 : vector<1x128xf32> to vector<8x128xf32>
    %43 = arith.addf %42, %41 : vector<8x128xf32>
    %44 = vector.extract_strided_slice %35 {offsets = [1, 0, 0], sizes = [1, 8, 16], strides = [1, 1, 1]} : vector<6x8x16xf32> to vector<1x8x16xf32>
    %45 = vector.shape_cast %44 : vector<1x8x16xf32> to vector<8x16xf32>
    %c1 = arith.constant 1 : index
    %c0_26 = arith.constant 0 : index
    %c0_27 = arith.constant 0 : index
    %46 = vector.load %arg8[%c1, %c0_26, %c0_27] : memref<6x16x128xf32, #tpu.memory_space<vmem>>, vector<1x16x128xf32>
    %47 = vector.shape_cast %46 : vector<1x16x128xf32> to vector<16x128xf32>
    %cst_28 = arith.constant dense<0.000000e+00> : vector<8x128xf32>
    %48 = tpu.matmul %45, %47, %cst_28 {dimension_numbers = #tpu.dot_dimension_numbers<[1], [0], [0], [1], [0, 0, 1, 1], [], []>} : vector<8x16xf32>, vector<16x128xf32>, vector<8x128xf32> -> vector<8x128xf32>
    %49 = arith.addf %43, %48 : vector<8x128xf32>
    %50 = vector.extract_strided_slice %35 {offsets = [2, 0, 0], sizes = [1, 8, 16], strides = [1, 1, 1]} : vector<6x8x16xf32> to vector<1x8x16xf32>
    %51 = vector.shape_cast %50 : vector<1x8x16xf32> to vector<8x16xf32>
    %c2 = arith.constant 2 : index
    %c0_29 = arith.constant 0 : index
    %c0_30 = arith.constant 0 : index
    %52 = vector.load %arg8[%c2, %c0_29, %c0_30] : memref<6x16x128xf32, #tpu.memory_space<vmem>>, vector<1x16x128xf32>
    %53 = vector.shape_cast %52 : vector<1x16x128xf32> to vector<16x128xf32>
    %cst_31 = arith.constant dense<0.000000e+00> : vector<8x128xf32>
    %54 = tpu.matmul %51, %53, %cst_31 {dimension_numbers = #tpu.dot_dimension_numbers<[1], [0], [0], [1], [0, 0, 1, 1], [], []>} : vector<8x16xf32>, vector<16x128xf32>, vector<8x128xf32> -> vector<8x128xf32>
    %55 = arith.addf %49, %54 : vector<8x128xf32>
    %56 = vector.extract_strided_slice %35 {offsets = [3, 0, 0], sizes = [1, 8, 16], strides = [1, 1, 1]} : vector<6x8x16xf32> to vector<1x8x16xf32>
    %57 = vector.shape_cast %56 : vector<1x8x16xf32> to vector<8x16xf32>
    %c3 = arith.constant 3 : index
    %c0_32 = arith.constant 0 : index
    %c0_33 = arith.constant 0 : index
    %58 = vector.load %arg8[%c3, %c0_32, %c0_33] : memref<6x16x128xf32, #tpu.memory_space<vmem>>, vector<1x16x128xf32>
    %59 = vector.shape_cast %58 : vector<1x16x128xf32> to vector<16x128xf32>
    %cst_34 = arith.constant dense<0.000000e+00> : vector<8x128xf32>
    %60 = tpu.matmul %57, %59, %cst_34 {dimension_numbers = #tpu.dot_dimension_numbers<[1], [0], [0], [1], [0, 0, 1, 1], [], []>} : vector<8x16xf32>, vector<16x128xf32>, vector<8x128xf32> -> vector<8x128xf32>
    %61 = arith.addf %55, %60 : vector<8x128xf32>
    %62 = vector.extract_strided_slice %35 {offsets = [4, 0, 0], sizes = [1, 8, 16], strides = [1, 1, 1]} : vector<6x8x16xf32> to vector<1x8x16xf32>
    %63 = vector.shape_cast %62 : vector<1x8x16xf32> to vector<8x16xf32>
    %c4 = arith.constant 4 : index
    %c0_35 = arith.constant 0 : index
    %c0_36 = arith.constant 0 : index
    %64 = vector.load %arg8[%c4, %c0_35, %c0_36] : memref<6x16x128xf32, #tpu.memory_space<vmem>>, vector<1x16x128xf32>
    %65 = vector.shape_cast %64 : vector<1x16x128xf32> to vector<16x128xf32>
    %cst_37 = arith.constant dense<0.000000e+00> : vector<8x128xf32>
    %66 = tpu.matmul %63, %65, %cst_37 {dimension_numbers = #tpu.dot_dimension_numbers<[1], [0], [0], [1], [0, 0, 1, 1], [], []>} : vector<8x16xf32>, vector<16x128xf32>, vector<8x128xf32> -> vector<8x128xf32>
    %67 = arith.addf %61, %66 : vector<8x128xf32>
    %68 = vector.extract_strided_slice %35 {offsets = [5, 0, 0], sizes = [1, 8, 16], strides = [1, 1, 1]} : vector<6x8x16xf32> to vector<1x8x16xf32>
    %69 = vector.shape_cast %68 : vector<1x8x16xf32> to vector<8x16xf32>
    %c5 = arith.constant 5 : index
    %c0_38 = arith.constant 0 : index
    %c0_39 = arith.constant 0 : index
    %70 = vector.load %arg8[%c5, %c0_38, %c0_39] : memref<6x16x128xf32, #tpu.memory_space<vmem>>, vector<1x16x128xf32>
    %71 = vector.shape_cast %70 : vector<1x16x128xf32> to vector<16x128xf32>
    %cst_40 = arith.constant dense<0.000000e+00> : vector<8x128xf32>
    %72 = tpu.matmul %69, %71, %cst_40 {dimension_numbers = #tpu.dot_dimension_numbers<[1], [0], [0], [1], [0, 0, 1, 1], [], []>} : vector<8x16xf32>, vector<16x128xf32>, vector<8x128xf32> -> vector<8x128xf32>
    %73 = arith.addf %67, %72 : vector<8x128xf32>
    %cst_41 = arith.constant 0.000000e+00 : f32
    %74 = vector.broadcast %cst_41 : f32 to vector<8x128xf32>
    %75 = arith.maximumf %73, %74 : vector<8x128xf32>
    %c0_42 = arith.constant 0 : index
    %c0_43 = arith.constant 0 : index
    %76 = vector.load %arg10[%c0_42, %c0_43] : memref<8x128xf32, #tpu.memory_space<vmem>>, vector<8x128xf32>
    tpu.vector_store %arg10[%c0_42, %c0_43], %75 {strides = array<i32>} : memref<8x128xf32, #tpu.memory_space<vmem>>, vector<8x128xf32>,
    return
  }
  func.func @transform_0(%arg0: i32) -> (i32, i32, i32) {
    %c0_i32 = arith.constant 0 : i32
    %c0_i32_0 = arith.constant 0 : i32
    %c0_i32_1 = arith.constant 0 : i32
    %c0_i32_2 = arith.constant 0 : i32
    return %c0_i32, %c0_i32_0, %c0_i32_1 : i32, i32, i32
  }
  func.func @transform_1(%arg0: i32) -> (i32, i32) {
    %c0_i32 = arith.constant 0 : i32
    %c0_i32_0 = arith.constant 0 : i32
    %c0_i32_1 = arith.constant 0 : i32
    return %c0_i32, %c0_i32_0 : i32, i32
  }
  func.func @transform_2(%arg0: i32) -> (i32, i32) {
    %c0_i32 = arith.constant 0 : i32
    %c0_i32_0 = arith.constant 0 : i32
    %c0_i32_1 = arith.constant 0 : i32
    return %c0_i32, %c0_i32_0 : i32, i32
  }
  func.func @transform_3(%arg0: i32) -> (i32, i32) {
    %c0_i32 = arith.constant 0 : i32
    %c0_i32_0 = arith.constant 0 : i32
    %c0_i32_1 = arith.constant 0 : i32
    return %c0_i32, %c0_i32_0 : i32, i32
  }
  func.func @transform_4(%arg0: i32) -> (i32, i32) {
    %c0_i32 = arith.constant 0 : i32
    %c0_i32_0 = arith.constant 0 : i32
    %c0_i32_1 = arith.constant 0 : i32
    return %c0_i32, %c0_i32_0 : i32, i32
  }
  func.func @transform_5(%arg0: i32) -> (i32, i32) {
    %c0_i32 = arith.constant 0 : i32
    %c0_i32_0 = arith.constant 0 : i32
    %c0_i32_1 = arith.constant 0 : i32
    return %c0_i32, %c0_i32_0 : i32, i32
  }
  func.func @transform_6(%arg0: i32) -> (i32, i32) {
    %c0_i32 = arith.constant 0 : i32
    %c0_i32_0 = arith.constant 0 : i32
    %c0_i32_1 = arith.constant 0 : i32
    return %c0_i32, %c0_i32_0 : i32, i32
  }
  func.func @transform_7(%arg0: i32) -> (i32, i32, i32) {
    %c0_i32 = arith.constant 0 : i32
    %c0_i32_0 = arith.constant 0 : i32
    %c0_i32_1 = arith.constant 0 : i32
    %c0_i32_2 = arith.constant 0 : i32
    return %c0_i32, %c0_i32_0, %c0_i32_1 : i32, i32, i32
  }
  func.func @transform_8(%arg0: i32) -> (i32, i32) {
    %c0_i32 = arith.constant 0 : i32
    %c0_i32_0 = arith.constant 0 : i32
    %c0_i32_1 = arith.constant 0 : i32
    return %c0_i32, %c0_i32_0 : i32, i32
  }
  func.func @transform_9(%arg0: i32) -> (i32, i32) {
    %c0_i32 = arith.constant 0 : i32
    %c0_i32_0 = arith.constant 0 : i32
    %c0_i32_1 = arith.constant 0 : i32
    return %c0_i32, %c0_i32_0 : i32, i32
  }
}

</mosaic_0001>

<bundles_post_ra>
// kernel: hrt_self_attention_forward.1
= control target key start
LH: loop header
LB: loop body
LE: loop exit
PB: predicated region body
PF: predicated region fallthrough
CT: control target
= control target key end

     0   :  { %vm63_vm0 = vcmask 130048   ;;  %s1719_s0 = inlined_call_operand.vmem [shape: f32[6,32,16], index: 0, kind: input, shape index: {}]   ;;  %s1720_s1 = inlined_call_operand.vmem [shape: f32[16,16], index: 1, kind: input, shape index: {}]   ;;  %s1721_s2 = inlined_call_operand.vmem [shape: f32[1,16], index: 2, kind: input, shape index: {}]   ;;  %s1722_s3 = inlined_call_operand.vmem [shape: f32[16,16], index: 3, kind: input, shape index: {}]   ;;  %s1723_s4 = inlined_call_operand.vmem [shape: f32[16,16], index: 4, kind: input, shape index: {}]   ;;  %s1724_s5 = inlined_call_operand.vmem [shape: f32[32,16], index: 5, kind: input, shape index: {}]   ;;  %s1725_s6 = inlined_call_operand.vmem [shape: f32[32,32], index: 6, kind: input, shape index: {}]   ;;  %s1726_s7 = inlined_call_operand.vmem [shape: f32[6,16,128], index: 7, kind: input, shape index: {}]   ;;  %s1727_s8 = inlined_call_operand.vmem [shape: f32[1,128], index: 8, kind: input, shape index: {}]   ;;  %s1728_s9 = inlined_call_operand.hbm [shape: f32[8,128], index: 9, kind: output, shape index: {}]  }
   0x1   :  { %v122_v0 = vld [vmem:[%s1722_s3 + $0x8] sm:$0xff]  ;;  %v121_v1 = vld [vmem:[%s1722_s3] sm:$0xff] }
   0x2   :  { %191 = vmatpush.msra.mxu1 %v122_v0  ;;  %v1271_v2 = vld [vmem:[%s1719_s0] sm:$0xff]  ;;  %1154 = vmatpush.msra.mxu3 %v122_v0 }
   0x4   :  { %192 = vmatpush.msra.mxu1 %v121_v1  ;;  %1155 = vmatpush.msra.mxu3 %v121_v1 }
   0x5   :  { %14 = vsyncpa [#allocation3], 0  ;;  %1048 = vmatmul.msk.f32.vlgmr.msra.gmra.mxu1 %vm63_vm0, %v1271_v2  ;;  %v58_v3 = vld [vmem:[%s1720_s1 + $0x8] sm:$0xff]  ;;  %v57_v4 = vld [vmem:[%s1720_s1] sm:$0xff]  ;;  %vm615_vm1 = vcmask 261120   ;;  %s1033_s14 = sshll.u32 %s1728_s9, 4  ;;  %s1034_s14 = int_to_ptr.hbm [resolvable:$true] %s1033_s14 }
   0x6   :  { %96 = vmatpush.msra.mxu0 %v58_v3  ;;  %v1286_v5 = vld [vmem:[%s1719_s0 + $0x8] sm:$0xff]  ;;  %v1293_v6 = vld [vmem:[%s1719_s0 + $0x20] sm:$0xff]  ;;  %v1300_v7 = vld [vmem:[%s1719_s0 + $0x10] sm:$0xff] }
   0x7   :  { %v1307_v8 = vld [vmem:[%s1719_s0 + $0x18] sm:$0xff]  ;;  %v1314_v9 = vld [vmem:[%s1719_s0 + $0x40] sm:$0xff]  ;;  %v1323_v10 = vld [vmem:[%s1719_s0 + $0x28] sm:$0xff] }
   0x8   :  { %97 = vmatpush.msra.mxu0 %v57_v4  ;;  %v1330_v11 = vld [vmem:[%s1719_s0 + $0x30] sm:$0xff]  ;;  %v1337_v12 = vld [vmem:[%s1719_s0 + $0x38] sm:$0xff]  ;;  %v1344_v13 = vld [vmem:[%s1719_s0 + $0x60] sm:$0xff] }
   0x9   :  { %1042 = vmatmul.msk.f32.vlgmr.msra.gmra.mxu0 %vm63_vm0, %v1271_v2  ;;  %v1353_v14 = vld [vmem:[%s1719_s0 + $0x48] sm:$0xff]  ;;  %v1360_v15 = vld [vmem:[%s1719_s0 + $0x50] sm:$0xff]  ;;  %v1367_v16 = vld [vmem:[%s1719_s0 + $0x58] sm:$0xff] }
   0xa   :  { %v1372_v17 = vld [vmem:[%s1719_s0 + $0xa8] sm:$0xff]  ;;  %v1381_v18 = vld [vmem:[%s1719_s0 + $0x80] sm:$0xff]  ;;  %v1386_v19 = vld [vmem:[%s1719_s0 + $0xb0] sm:$0xff] }
   0xb   :  { %1069 = vmatmul.msk.f32.vlgmr.msra.gmra.mxu3 %vm63_vm0, %v1372_v17  ;;  %v1397_v20 = vld [vmem:[%s1719_s0 + $0x68] sm:$0xff]  ;;  %v1402_v21 = vld [vmem:[%s1719_s0 + $0xb8] sm:$0xff]  ;;  %v1411_v22 = vld [vmem:[%s1719_s0 + $0x70] sm:$0xff] }
   0xc   :  { %v1418_v23 = vld [vmem:[%s1719_s0 + $0x78] sm:$0xff]  ;;  %v1427_v26 = vld [vmem:[%s1719_s0 + $0x88] sm:$0xff]  ;;  %v1434_v28 = vld [vmem:[%s1719_s0 + $0x90] sm:$0xff] }
   0xd   :  { %1049 = vmatmul.msk.f32.gmra.mxu1 %vm63_vm0, %v1286_v5  ;;  %v1439_v29 = vld [vmem:[%s1719_s0 + $0xa0] sm:$0xff]  ;;  %v1448_v30 = vld [vmem:[%s1724_s5 + $0x18] sm:$0xff]  ;;  %v1459_v34 = vld [vmem:[%s1724_s5 + $0x10] sm:$0xff] }
   0xe   :  { %v1453_v32 = vld [vmem:[%s1719_s0 + $0x98] sm:$0xff]  ;;  %v1468_v36 = vld [vmem:[%s1724_s5 + $0x8] sm:$0xff]  ;;  %v1475_v39 = vld [vmem:[%s1724_s5] sm:$0xff] }
   0xf   :  { %v1480_v40 = vld [vmem:[%s1721_s2] ss:$0 sm:$0xff]  ;;  %v291_v51 = vld [vmem:[%s1723_s4 + $0x8] sm:$0xff] }
  0x10   :  { %306 = vmatpush.msrb.mxu0 %v291_v51  ;;  %1156 = vmatpush.msra.mxu2 %v291_v51  ;;  %v290_v57 = vld [vmem:[%s1723_s4] sm:$0xff] }
  0x11   :  { %1043 = vmatmul.msk.f32.gmra.mxu0 %vm63_vm0, %v1293_v6 }
  0x12   :  { %307 = vmatpush.msrb.mxu0 %v290_v57  ;;  %1157 = vmatpush.msra.mxu2 %v290_v57 }
  0x13   :  { %1070 = vmatmul.msk.f32.gmra.mxu3 %vm63_vm0, %v1386_v19  ;;  %1075 = vmatmul.msk.f32.vlgmr.msra.gmra.mxu2 %vm63_vm0, %v1307_v8 }
  0x15   :  { %1050 = vmatmul.msk.f32.gmra.mxu1 %vm63_vm0, %v1300_v7 }
  0x19   :  { %1044 = vmatmul.msk.f32.gmra.mxu0 %vm63_vm0, %v1314_v9 }
  0x1b   :  { %1071 = vmatmul.msk.f32.gmra.mxu3 %vm63_vm0, %v1402_v21  ;;  %1076 = vmatmul.msk.f32.gmra.mxu2 %vm63_vm0, %v1293_v6 }
  0x1d   :  { %1051 = vmatmul.msk.f32.gmra.mxu1 %vm63_vm0, %v1307_v8 }
  0x21   :  { %1045 = vmatmul.msk.f32.gmra.mxu0 %vm63_vm0, %v1344_v13 }
  0x23   :  { %1077 = vmatmul.msk.f32.gmra.mxu2 %vm63_vm0, %v1323_v10 }
  0x25   :  { %1052 = vmatmul.msk.f32.gmra.mxu1 %vm63_vm0, %v1293_v6 }
  0x29   :  { %1046 = vmatmul.msk.f32.gmra.mxu0 %vm63_vm0, %v1381_v18 }
  0x2b   :  { %1078 = vmatmul.msk.f32.gmra.mxu2 %vm63_vm0, %v1330_v11 }
  0x2d   :  { %1053 = vmatmul.msk.f32.gmra.mxu1 %vm63_vm0, %v1323_v10 }
  0x31   :  { %1047 = vmatmul.msk.f32.gmra.mxu0 %vm63_vm0, %v1439_v29 }
  0x33   :  { %1079 = vmatmul.msk.f32.gmra.mxu2 %vm63_vm0, %v1337_v12 }
  0x35   :  { %1054 = vmatmul.msk.f32.gmra.mxu1 %vm63_vm0, %v1330_v11 }
  0x39   :  { %1072 = vmatmul.msk.f32.vlgmr.msrb.gmra.mxu0 %vm63_vm0, %v1271_v2 }
  0x3b   :  { %1080 = vmatmul.msk.f32.gmra.mxu2 %vm63_vm0, %v1314_v9 }
  0x3d   :  { %1055 = vmatmul.msk.f32.gmra.mxu1 %vm63_vm0, %v1337_v12 }
  0x41   :  { %1073 = vmatmul.msk.f32.gmra.mxu0 %vm63_vm0, %v1286_v5 }
  0x43   :  { %1081 = vmatmul.msk.f32.gmra.mxu2 %vm63_vm0, %v1353_v14 }
  0x45   :  { %1056 = vmatmul.msk.f32.gmra.mxu1 %vm63_vm0, %v1314_v9 }
  0x49   :  { %1074 = vmatmul.msk.f32.gmra.mxu0 %vm63_vm0, %v1300_v7 }
  0x4b   :  { %1082 = vmatmul.msk.f32.gmra.mxu2 %vm63_vm0, %v1360_v15 }
  0x4d   :  { %1057 = vmatmul.msk.f32.gmra.mxu1 %vm63_vm0, %v1353_v14 }
  0x53   :  { %1083 = vmatmul.msk.f32.gmra.mxu2 %vm63_vm0, %v1367_v16 }
  0x55   :  { %1058 = vmatmul.msk.f32.gmra.mxu1 %vm63_vm0, %v1360_v15 }
  0x5b   :  { %1084 = vmatmul.msk.f32.gmra.mxu2 %vm63_vm0, %v1344_v13 }
  0x5d   :  { %1059 = vmatmul.msk.f32.gmra.mxu1 %vm63_vm0, %v1367_v16 }
  0x63   :  { %1085 = vmatmul.msk.f32.gmra.mxu2 %vm63_vm0, %v1397_v20 }
  0x65   :  { %1060 = vmatmul.msk.f32.gmra.mxu1 %vm63_vm0, %v1344_v13 }
  0x6b   :  { %1086 = vmatmul.msk.f32.gmra.mxu2 %vm63_vm0, %v1411_v22 }
  0x6d   :  { %1061 = vmatmul.msk.f32.gmra.mxu1 %vm63_vm0, %v1397_v20 }
  0x73   :  { %1087 = vmatmul.msk.f32.gmra.mxu2 %vm63_vm0, %v1418_v23 }
  0x75   :  { %1062 = vmatmul.msk.f32.gmra.mxu1 %vm63_vm0, %v1411_v22 }
  0x7b   :  { %1088 = vmatmul.msk.f32.gmra.mxu2 %vm63_vm0, %v1381_v18 }
  0x7d   :  { %1063 = vmatmul.msk.f32.gmra.mxu1 %vm63_vm0, %v1418_v23  ;;  %v654_v23 = vld [vmem:[%s1725_s6 + $0x10] sm:$0xff] }
  0x82   :  { %v194_v24 = vpop.f32.mrf.mxu1 }
  0x83   :  { %v266_v42 = vmul.f32 %v194_v24, %v1475_v39  ;;  %1089 = vmatmul.msk.f32.gmra.mxu2 %vm63_vm0, %v1427_v26 }
  0x85   :  { %1064 = vmatmul.msk.f32.gmra.mxu1 %vm63_vm0, %v1381_v18 }
  0x86   :  { %v99_v41 = vpop.f32.mrf.mxu0 }
  0x87   :  { %v100_v43 = vadd.f32 %v1480_v40, %v99_v41 }
  0x8a   :  { %v197_v25 = vpop.f32.mrf.mxu1 }
  0x8b   :  { %v267_v38 = vmul.f32 %v197_v25, %v1468_v36  ;;  %1090 = vmatmul.msk.f32.gmra.mxu2 %vm63_vm0, %v1434_v28 }
  0x8d   :  { %1065 = vmatmul.msk.f32.gmra.mxu1 %vm63_vm0, %v1427_v26 }
  0x8e   :  { %v102_v52 = vpop.f32.mrf.mxu0  ;;  %v257_v3 = vpop.f32.mrf.mxu3 }
  0x8f   :  { %v103_v54 = vadd.f32 %v1480_v40, %v102_v52  ;;  %v287_v14 = vmul.f32 %v257_v3, %v1468_v36 }
  0x92   :  { %v200_v27 = vpop.f32.mrf.mxu1 }
  0x93   :  { %v268_v35 = vmul.f32 %v200_v27, %v1459_v34  ;;  %1091 = vmatmul.msk.f32.gmra.mxu2 %vm63_vm0, %v1453_v32 }
  0x95   :  { %1066 = vmatmul.msk.f32.gmra.mxu1 %vm63_vm0, %v1434_v28 }
  0x96   :  { %v105_v63 = vpop.f32.mrf.mxu0  ;;  %v260_v5 = vpop.f32.mrf.mxu3 }
  0x97   :  { %v106_v1 = vadd.f32 %v1480_v40, %v105_v63  ;;  %v318_v28 = vpop.f32.mrf.mxu2 }
  0x9a   :  { %v203_v31 = vpop.f32.mrf.mxu1 }
  0x9b   :  { %v269_v33 = vmul.f32 %v203_v31, %v1448_v30  ;;  %v288_v31 = vmul.f32 %v260_v5, %v1459_v34  ;;  %1092 = vmatmul.msk.f32.gmra.mxu2 %vm63_vm0, %v1439_v29 }
  0x9d   :  { %1067 = vmatmul.msk.f32.gmra.mxu1 %vm63_vm0, %v1453_v32  ;;  %1096 = vmatpush.xpose.msk.msrb.mxu3 %vm63_vm0, %v269_v33  ;;  %v652_v32 = vld [vmem:[%s1725_s6] sm:$0xff] }
  0x9e   :  { %v263_v24 = vpop.f32.mrf.mxu3  ;;  %v108_v12 = vpop.f32.mrf.mxu0 }
  0x9f   :  { %v289_v25 = vmul.f32 %v263_v24, %v1448_v30  ;;  %v109_v27 = vadd.f32 %v1480_v40, %v108_v12  ;;  %v321_v3 = vpop.f32.mrf.mxu2 }
  0xa1   :  { %1097 = vmatpush.xpose.msk.msrb.mxu3 %vm63_vm0, %v268_v35 }
  0xa2   :  { %v206_v37 = vpop.f32.mrf.mxu1 }
  0xa3   :  { %v270_v53 = vmul.f32 %v206_v37, %v1475_v39  ;;  %1093 = vmatmul.msk.f32.gmra.mxu2 %vm63_vm0, %v1372_v17 }
  0xa5   :  { %1098 = vmatpush.xpose.msk.msrb.mxu3 %vm63_vm0, %v267_v38  ;;  %1068 = vmatmul.msk.f32.gmra.mxu1 %vm63_vm0, %v1439_v29 }
  0xa6   :  { %v111_v37 = vpop.f32.mrf.mxu0 }
  0xa9   :  { %1099 = vmatpush.xpose.msk.msrb.mxu3 %vm63_vm0, %v266_v42 }
  0xaa   :  { %v209_v44 = vpop.f32.mrf.mxu1 }
  0xab   :  { %v271_v50 = vmul.f32 %v209_v44, %v1468_v36  ;;  %1094 = vmatmul.msk.f32.gmra.mxu2 %vm63_vm0, %v1386_v19 }
  0xac   :  { %1100 = vmatmul.msk.f32.vlgmr.msrb.gmra.mxu3 %vm63_vm0, %v100_v43 }
  0xae   :  { %v114_v42 = vpop.f32.mrf.mxu0 }
  0xaf   :  { %v115_v16 = vadd.f32 %v1480_v40, %v114_v42 }
  0xb2   :  { %v212_v45 = vpop.f32.mrf.mxu1 }
  0xb3   :  { %v272_v48 = vmul.f32 %v212_v45, %v1459_v34  ;;  %1095 = vmatmul.msk.f32.gmra.mxu2 %vm63_vm0, %v1402_v21 }
  0xb6   :  { %v309_v18 = vpop.f32.mrf.mxu0 }
  0xb7   :  { %v381_v17 = vmul.f32 %v309_v18, %v1475_v39 }
  0xba   :  { %v215_v46 = vpop.f32.mrf.mxu1 }
  0xbb   :  { %v273_v47 = vmul.f32 %v215_v46, %v1448_v30  ;;  %v112_v46 = vadd.f32 %v1480_v40, %v111_v37 }
  0xbd   :  { %1101 = vmatpush.xpose.msk.msra.mxu3 %vm63_vm0, %v273_v47 }
  0xbe   :  { %v312_v26 = vpop.f32.mrf.mxu0 }
  0xbf   :  { %v382_v29 = vmul.f32 %v312_v26, %v1468_v36 }
  0xc1   :  { %1102 = vmatpush.xpose.msk.msra.mxu3 %vm63_vm0, %v272_v48  ;;  %v655_v48 = vld [vmem:[%s1725_s6 + $0x18] sm:$0xff] }
  0xc2   :  { %v218_v49 = vpop.f32.mrf.mxu1 }
  0xc3   :  { %v274_v0 = vmul.f32 %v218_v49, %v1475_v39  ;;  %v384_v49 = vmul.f32 %v318_v28, %v1448_v30 }
  0xc5   :  { %1103 = vmatpush.xpose.msk.msra.mxu3 %vm63_vm0, %v271_v50  ;;  %v653_v50 = vld [vmem:[%s1725_s6 + $0x8] sm:$0xff] }
  0xc6   :  { %v315_v51 = vpop.f32.mrf.mxu0 }
  0xc7   :  { %v383_v52 = vmul.f32 %v315_v51, %v1459_v34 }
  0xc9   :  { %1104 = vmatpush.xpose.msk.msra.mxu3 %vm63_vm0, %v270_v53 }
  0xca   :  { %v221_v55 = vpop.f32.mrf.mxu1 }
  0xcb   :  { %v275_v62 = vmul.f32 %v221_v55, %v1468_v36 }
  0xcc   :  { %1105 = vmatmul.msk.f32.vlgmr.msra.gmra.mxu3 %vm63_vm0, %v103_v54 }
  0xd2   :  { %v224_v56 = vpop.f32.mrf.mxu1 }
  0xd3   :  { %v276_v60 = vmul.f32 %v224_v56, %v1459_v34 }
  0xda   :  { %v227_v58 = vpop.f32.mrf.mxu1 }
  0xdb   :  { %v277_v59 = vmul.f32 %v227_v58, %v1448_v30 }
  0xdd   :  { %1106 = vmatpush.xpose.msk.msrb.mxu3 %vm63_vm0, %v277_v59 }
  0xe1   :  { %1107 = vmatpush.xpose.msk.msrb.mxu3 %vm63_vm0, %v276_v60 }
  0xe2   :  { %v230_v61 = vpop.f32.mrf.mxu1 }
  0xe3   :  { %v278_v9 = vmul.f32 %v230_v61, %v1475_v39 }
  0xe5   :  { %1108 = vmatpush.xpose.msk.msrb.mxu3 %vm63_vm0, %v275_v62 }
  0xe9   :  { %1109 = vmatpush.xpose.msk.msrb.mxu3 %vm63_vm0, %v274_v0 }
  0xea   :  { %v233_v2 = vpop.f32.mrf.mxu1 }
  0xeb   :  { %v279_v11 = vmul.f32 %v233_v2, %v1468_v36 }
  0xec   :  { %1110 = vmatmul.msk.f32.vlgmr.msrb.gmra.mxu3 %vm63_vm0, %v106_v1 }
  0xf2   :  { %v236_v4 = vpop.f32.mrf.mxu1 }
  0xf3   :  { %v280_v8 = vmul.f32 %v236_v4, %v1459_v34 }
  0xfa   :  { %v239_v6 = vpop.f32.mrf.mxu1 }
  0xfb   :  { %v281_v7 = vmul.f32 %v239_v6, %v1448_v30 }
  0xfd   :  { %1111 = vmatpush.xpose.msk.msra.mxu0 %vm63_vm0, %v281_v7  ;;  %v324_v7 = vpop.f32.mrf.mxu2 }
 0x101   :  { %1112 = vmatpush.xpose.msk.msra.mxu0 %vm63_vm0, %v280_v8 }
 0x102   :  { %v242_v10 = vpop.f32.mrf.mxu1 }
 0x103   :  { %v282_v13 = vmul.f32 %v242_v10, %v1475_v39 }
 0x105   :  { %1113 = vmatpush.xpose.msk.msra.mxu0 %vm63_vm0, %v279_v11  ;;  %v327_v10 = vpop.f32.mrf.mxu2 }
 0x106   :  { %v387_v24 = vmul.f32 %v327_v10, %v1459_v34 }
 0x109   :  { %1114 = vmatpush.xpose.msk.msra.mxu0 %vm63_vm0, %v278_v9  ;;  %v386_v9 = vmul.f32 %v324_v7, %v1468_v36 }
 0x10a   :  { %v245_v33 = vpop.f32.mrf.mxu1 }
 0x10b   :  { %v283_v44 = vmul.f32 %v245_v33, %v1468_v36 }
 0x10c   :  { %1115 = vmatmul.msk.f32.vlgmr.msra.gmra.mxu0 %vm63_vm0, %v109_v27 }
 0x10d   :  { %1121 = vmatpush.xpose.msk.msrb.mxu0 %vm63_vm0, %v289_v25  ;;  %v330_v11 = vpop.f32.mrf.mxu2 }
 0x10e   :  { %v388_v12 = vmul.f32 %v330_v11, %v1448_v30 }
 0x111   :  { %1122 = vmatpush.xpose.msk.msrb.mxu0 %vm63_vm0, %v288_v31  ;;  %v385_v31 = vmul.f32 %v321_v3, %v1475_v39 }
 0x112   :  { %v248_v35 = vpop.f32.mrf.mxu1 }
 0x113   :  { %v284_v15 = vmul.f32 %v248_v35, %v1459_v34 }
 0x115   :  { %1123 = vmatpush.xpose.msk.msrb.mxu0 %vm63_vm0, %v287_v14  ;;  %v333_v14 = vpop.f32.mrf.mxu2 }
 0x11a   :  { %v251_v38 = vpop.f32.mrf.mxu1 }
 0x11b   :  { %v285_v41 = vmul.f32 %v251_v38, %v1448_v30 }
 0x11d   :  { %1116 = vmatpush.xpose.msk.msra.mxu3 %vm63_vm0, %v285_v41  ;;  %v336_v37 = vpop.f32.mrf.mxu2 }
 0x121   :  { %1117 = vmatpush.xpose.msk.msra.mxu3 %vm63_vm0, %v284_v15 }
 0x122   :  { %v254_v43 = vpop.f32.mrf.mxu1 }
 0x123   :  { %v286_v45 = vmul.f32 %v254_v43, %v1475_v39  ;;  %v390_v43 = vmul.f32 %v336_v37, %v1468_v36 }
 0x125   :  { %1118 = vmatpush.xpose.msk.msra.mxu3 %vm63_vm0, %v283_v44  ;;  %1124 = vmatpush.xpose.msk.msrb.mxu0 %vm63_vm0, %v286_v45  ;;  %v339_v38 = vpop.f32.mrf.mxu2  ;;  %v389_v44 = vmul.f32 %v333_v14, %v1475_v39 }
 0x126   :  { %v391_v15 = vmul.f32 %v339_v38, %v1459_v34  ;;  %v1146_v38 = vld [vmem:[%s1726_s7 + $0x38] sm:$0xff] }
 0x128   :  { %1125 = vmatmul.msk.f32.vlgmr.msrb.gmra.mxu0 %vm63_vm0, %v115_v16 }
 0x129   :  { %1119 = vmatpush.xpose.msk.msra.mxu3 %vm63_vm0, %v282_v13  ;;  %759 = vmatpush.msra.mxu0 %v388_v12 }
 0x12b   :  { %760 = vmatpush.msra.mxu0 %v387_v24  ;;  %v861_v24 = vld [vmem:[%s1726_s7 + $0x8] sm:$0xff] }
 0x12c   :  { %1120 = vmatmul.msk.f32.vlgmr.msra.gmra.mxu3 %vm63_vm0, %v112_v46 }
 0x12d   :  { %686 = vmatpush.msrb.mxu3 %v655_v48  ;;  %761 = vmatpush.msra.mxu0 %v386_v9  ;;  %v342_v41 = vpop.f32.mrf.mxu2  ;;  %v1143_v9 = vld [vmem:[%s1726_s7 + $0x28] sm:$0xff] }
 0x12e   :  { %v392_v42 = vmul.f32 %v342_v41, %v1448_v30  ;;  %v1145_v41 = vld [vmem:[%s1726_s7 + $0x30] sm:$0xff] }
 0x12f   :  { %v437_v47 = vpop.f32.mrf.mxu3  ;;  %687 = vmatpush.msrb.mxu3 %v654_v23  ;;  %762 = vmatpush.msra.mxu0 %v385_v31 }
 0x130   :  { %v616_v20 = vsel %vm615_vm1, %v437_v47, -inf }
 0x131   :  { %617 = vmax.xlane.f32.xlu0 %v616_v20  ;;  %688 = vmatpush.msrb.mxu3 %v653_v50 }
 0x132   :  { %782 = vmatpush.msrb.mxu0 %v392_v42  ;;  %v1148_v42 = vld [vmem:[%s1726_s7 + $0x40] sm:$0xff] }
 0x133   :  { %689 = vmatpush.msrb.mxu3 %v652_v32 }
 0x134   :  { %783 = vmatpush.msrb.mxu0 %v391_v15  ;;  %v1149_v15 = vld [vmem:[%s1726_s7 + $0x48] sm:$0xff] }
 0x135   :  { %736 = vmatpush.msra.mxu3 %v384_v49  ;;  %v345_v13 = vpop.f32.mrf.mxu2 }
 0x136   :  { %784 = vmatpush.msrb.mxu0 %v390_v43 }
 0x137   :  { %737 = vmatpush.msra.mxu3 %v383_v52 }
 0x138   :  { %785 = vmatpush.msrb.mxu0 %v389_v44 }
 0x139   :  { %738 = vmatpush.msra.mxu3 %v382_v29 }
 0x13b   :  { %739 = vmatpush.msra.mxu3 %v381_v17 }
 0x14f   :  { %v472_v40 = vpop.f32.mrf.mxu3 }
 0x150   :  { %v619_v22 = vsel %vm615_vm1, %v472_v40, -inf }
 0x151   :  { %620 = vmax.xlane.f32.xlu0 %v619_v22 }
 0x16f   :  { %v507_v53 = vpop.f32.mrf.mxu3 }
 0x170   :  { %v622_v54 = vsel %vm615_vm1, %v507_v53, -inf }
 0x171   :  { %623 = vmax.xlane.f32.xlu1 %v622_v54 }
 0x189   :  { %v542_v55 = vpop.f32.mrf.mxu0 }
 0x18a   :  { %v625_v56 = vsel %vm615_vm1, %v542_v55, -inf }
 0x18b   :  { %626 = vmax.xlane.f32.xlu1 %v625_v56 }
 0x1a4   :  { %v618_v57 = vpop.xlane.xlu0 %617 }
 0x1a5   :  { %v634_v58 = vsub.f32 %v437_v47, %v618_v57  ;;  %v612_v62 = vpop.f32.mrf.mxu0  ;;  %v393_v57 = vmul.f32 %v345_v13, %v1475_v39 }
 0x1a6   :  { %v631_v21 = vsel %vm615_vm1, %v612_v62, -inf }
 0x1a7   :  { %v640_v59 = vmul.f32 1.442695, %v634_v58 }
 0x1a9   :  { %1161 = vpow2.f32 %v640_v59 }
 0x1af   :  { %v1613_v19 = vpop.eup %1161  ;;  %v577_v60 = vpop.f32.mrf.mxu3 }
 0x1b0   :  { %1126 = vmatmul.msk.f32.vlgmr.msrb.gmra.mxu3 %vm615_vm1, %v1613_v19  ;;  %v628_v61 = vsel %vm615_vm1, %v577_v60, -inf }
 0x1b1   :  { %629 = vmax.xlane.f32.xlu2 %v628_v61  ;;  %879 = vmatpush.msrb.mxu3 %v861_v24 }
 0x1b9   :  { %632 = vmax.xlane.f32.xlu2 %v631_v21 }
 0x1c4   :  { %v621_v63 = vpop.xlane.xlu0 %620 }
 0x1c5   :  { %v635_v0 = vsub.f32 %v472_v40, %v621_v63  ;;  %v348_v40 = vpop.f32.mrf.mxu2 }
 0x1c7   :  { %v642_v1 = vmul.f32 1.442695, %v635_v0 }
 0x1c9   :  { %1163 = vpow2.f32 %v642_v1 }
 0x1cd   :  { %v351_v26 = vpop.f32.mrf.mxu2 }
 0x1ce   :  { %v395_v54 = vmul.f32 %v351_v26, %v1459_v34 }
 0x1cf   :  { %v1619_v2 = vpop.eup %1163 }
 0x1d0   :  { %1127 = vmatmul.msk.f32.gmra.mxu3 %vm615_vm1, %v1619_v2 }
 0x1d5   :  { %v354_v50 = vpop.f32.mrf.mxu2 }
 0x1d6   :  { %v396_v17 = vmul.f32 %v354_v50, %v1448_v30 }
 0x1dd   :  { %v357_v51 = vpop.f32.mrf.mxu2 }
 0x1de   :  { %v397_v1 = vmul.f32 %v357_v51, %v1475_v39 }
 0x1e4   :  { %v624_v4 = vpop.xlane.xlu1 %623 }
 0x1e5   :  { %v636_v5 = vsub.f32 %v507_v53, %v624_v4  ;;  %v360_v52 = vpop.f32.mrf.mxu2 }
 0x1e6   :  { %v398_v0 = vmul.f32 %v360_v52, %v1468_v36 }
 0x1e7   :  { %v644_v6 = vmul.f32 1.442695, %v636_v5 }
 0x1e9   :  { %1165 = vpow2.f32 %v644_v6 }
 0x1ed   :  { %v363_v56 = vpop.f32.mrf.mxu2 }
 0x1ee   :  { %v399_v21 = vmul.f32 %v363_v56, %v1459_v34 }
 0x1ef   :  { %v1623_v8 = vpop.eup %1165 }
 0x1f0   :  { %1128 = vmatmul.msk.f32.gmra.mxu3 %vm615_vm1, %v1623_v8 }
 0x1f5   :  { %v366_v58 = vpop.f32.mrf.mxu2 }
 0x1f6   :  { %v400_v61 = vmul.f32 %v366_v58, %v1448_v30 }
 0x1fe   :  { %v627_v25 = vpop.xlane.xlu1 %626 }
 0x1ff   :  { %v637_v27 = vsub.f32 %v542_v55, %v627_v25  ;;  %v394_v55 = vmul.f32 %v348_v40, %v1468_v36  ;;  %v1160_v40 = vld [vmem:[%s1727_s8] ss:$0 sm:$0xff] }
 0x201   :  { %v646_v33 = vmul.f32 1.442695, %v637_v27  ;;  %v1139_v27 = vld [vmem:[%s1726_s7 + $0x10] sm:$0xff] }
 0x203   :  { %1167 = vpow2.f32 %v646_v33 }
 0x209   :  { %v1631_v35 = vpop.eup %1167 }
 0x20a   :  { %1129 = vmatmul.msk.f32.gmra.mxu3 %vm615_vm1, %v1631_v35 }
 0x224   :  { %v630_v45 = vpop.xlane.xlu2 %629 }
 0x225   :  { %v638_v16 = vsub.f32 %v577_v60, %v630_v45  ;;  %v1152_v45 = vld [vmem:[%s1726_s7 + $0x58] sm:$0xff] }
 0x227   :  { %v648_v46 = vmul.f32 1.442695, %v638_v16  ;;  %v1151_v16 = vld [vmem:[%s1726_s7 + $0x50] sm:$0xff] }
 0x229   :  { %1169 = vpow2.f32 %v648_v46 }
 0x22c   :  { %v633_v47 = vpop.xlane.xlu2 %632 }
 0x22d   :  { %v639_v20 = vsub.f32 %v612_v62, %v633_v47 }
 0x22f   :  { %v1639_v22 = vpop.eup %1169  ;;  %v650_v48 = vmul.f32 1.442695, %v639_v20 }
 0x230   :  { %1130 = vmatmul.msk.f32.gmra.mxu3 %vm615_vm1, %v1639_v22 }
 0x231   :  { %1171 = vpow2.f32 %v650_v48 }
 0x233   :  { %v691_v23 = vpop.f32.mrf.mxu3 }
 0x234   :  { %1173 = vrcp.f32 %v691_v23 }
 0x237   :  { %v1643_v18 = vpop.eup %1171 }
 0x238   :  { %1131 = vmatmul.msk.f32.gmra.mxu3 %vm615_vm1, %v1643_v18 }
 0x23a   :  { %v1174_v28 = vpop.eup %1173 }
 0x23b   :  { %v715_v49 = vmul.f32 %v1174_v28, %v1613_v19  ;;  %v369_v19 = vpop.f32.mrf.mxu2 }
 0x23c   :  { %v401_v11 = vmul.f32 %v369_v19, %v1475_v39  ;;  %v1140_v39 = vld [vmem:[%s1726_s7 + $0x18] sm:$0xff] }
 0x240   :  { %1132 = vmatmul.msk.f32.vlgmr.msra.gmra.mxu3 %vm615_vm1, %v715_v49 }
 0x243   :  { %v372_v63 = vpop.f32.mrf.mxu2 }
 0x244   :  { %v402_v10 = vmul.f32 %v372_v63, %v1468_v36 }
 0x253   :  { %v694_v32 = vpop.f32.mrf.mxu3 }
 0x254   :  { %1175 = vrcp.f32 %v694_v32 }
 0x25a   :  { %v1176_v29 = vpop.eup %1175 }
 0x25b   :  { %v716_v53 = vmul.f32 %v1176_v29, %v1619_v2  ;;  %v375_v2 = vpop.f32.mrf.mxu2 }
 0x25d   :  { %1133 = vmatmul.msk.f32.vlgmr.msra.gmra.mxu0 %vm615_vm1, %v716_v53 }
 0x25e   :  { %805 = vmatpush.msra.mxu0 %v396_v17 }
 0x260   :  { %806 = vmatpush.msra.mxu0 %v395_v54 }
 0x262   :  { %807 = vmatpush.msra.mxu0 %v394_v55 }
 0x263   :  { %v378_v4 = vpop.f32.mrf.mxu2 }
 0x264   :  { %808 = vmatpush.msra.mxu0 %v393_v57  ;;  %v404_v6 = vmul.f32 %v378_v4, %v1448_v30  ;;  %v860_v30 = vld [vmem:[%s1726_s7] sm:$0xff] }
 0x265   :  { %880 = vmatpush.msrb.mxu3 %v860_v30 }
 0x267   :  { %936 = vmatpush.msra.mxu3 %v1143_v9 }
 0x273   :  { %v697_v59 = vpop.f32.mrf.mxu3 }
 0x274   :  { %1177 = vrcp.f32 %v697_v59 }
 0x27a   :  { %v1178_v60 = vpop.eup %1177 }
 0x27b   :  { %v717_v62 = vmul.f32 %v1178_v60, %v1623_v8  ;;  %v403_v8 = vmul.f32 %v375_v2, %v1459_v34 }
 0x27d   :  { %1134 = vmatmul.msk.f32.vlgmr.msrb.gmra.mxu0 %vm615_vm1, %v717_v62 }
 0x27e   :  { %828 = vmatpush.msrb.mxu0 %v400_v61 }
 0x280   :  { %829 = vmatpush.msrb.mxu0 %v399_v21 }
 0x282   :  { %830 = vmatpush.msrb.mxu0 %v398_v0 }
 0x284   :  { %831 = vmatpush.msrb.mxu0 %v397_v1 }
 0x28d   :  { %v700_v3 = vpop.f32.mrf.mxu3 }
 0x28e   :  { %1179 = vrcp.f32 %v700_v3 }
 0x294   :  { %v1180_v5 = vpop.eup %1179 }
 0x295   :  { %v718_v7 = vmul.f32 %v1180_v5, %v1631_v35  ;;  %v1142_v35 = vld [vmem:[%s1726_s7 + $0x20] sm:$0xff]  ;;  %s1211_s7 = smov [#allocation2]  }
 0x296   :  { %937 = vmatpush.msra.mxu3 %v1142_v35  ;;  %s1031_s12 = sshll.u32 %s1211_s7, 4  ;;  %s1032_s12 = int_to_ptr.vmem [resolvable:$true] %s1031_s12 }
 0x297   :  { %1135 = vmatmul.msk.f32.vlgmr.msra.gmra.mxu0 %vm615_vm1, %v718_v7 }
 0x298   :  { %851 = vmatpush.msra.mxu0 %v404_v6 }
 0x29a   :  { %852 = vmatpush.msra.mxu0 %v403_v8 }
 0x29c   :  { %853 = vmatpush.msra.mxu0 %v402_v10 }
 0x29e   :  { %854 = vmatpush.msra.mxu0 %v401_v11 }
 0x2b3   :  { %v703_v34 = vpop.f32.mrf.mxu3 }
 0x2b4   :  { %1181 = vrcp.f32 %v703_v34 }
 0x2ba   :  { %v1182_v12 = vpop.eup %1181 }
 0x2bb   :  { %v719_v36 = vmul.f32 %v1182_v12, %v1639_v22  ;;  %v706_v25 = vpop.f32.mrf.mxu3 }
 0x2bc   :  { %1183 = vrcp.f32 %v706_v25 }
 0x2bd   :  { %1136 = vmatmul.msk.f32.vlgmr.msrb.gmra.mxu0 %vm615_vm1, %v719_v36 }
 0x2be   :  { %909 = vmatpush.msrb.mxu0 %v1140_v39 }
 0x2c0   :  { %910 = vmatpush.msrb.mxu0 %v1139_v27 }
 0x2c2   :  { %v1184_v31 = vpop.eup %1183 }
 0x2c3   :  { %v720_v33 = vmul.f32 %v1184_v31, %v1643_v18  ;;  %v741_v14 = vpop.f32.mrf.mxu3 }
 0x2c4   :  { %1138 = vmatmul.msk.f32.vlgmr.msrb.gmra.mxu3 %vm63_vm0, %v741_v14 }
 0x2c5   :  { %1137 = vmatmul.msk.f32.vlgmr.msra.gmra.mxu0 %vm615_vm1, %v720_v33  ;;  %990 = vmatpush.msrb.mxu3 %v1149_v15 }
 0x2c6   :  { %963 = vmatpush.msra.mxu0 %v1146_v38 }
 0x2c7   :  { %991 = vmatpush.msrb.mxu3 %v1148_v42 }
 0x2c8   :  { %964 = vmatpush.msra.mxu0 %v1145_v41 }
 0x2da   :  { %v764_v37 = vpop.f32.mrf.mxu0 }
 0x2db   :  { %1141 = vmatmul.msk.f32.vlgmr.msrb.gmra.mxu0 %vm63_vm0, %v764_v37 }
 0x2dc   :  { %1017 = vmatpush.msrb.mxu0 %v1152_v45 }
 0x2de   :  { %1018 = vmatpush.msrb.mxu0 %v1151_v16 }
 0x2fa   :  { %v787_v43 = vpop.f32.mrf.mxu0 }
 0x2fb   :  { %1144 = vmatmul.msk.f32.vlgmr.msra.gmra.mxu3 %vm63_vm0, %v787_v43 }
 0x314   :  { %v810_v44 = vpop.f32.mrf.mxu0 }
 0x315   :  { %1147 = vmatmul.msk.f32.vlgmr.msra.gmra.mxu0 %vm63_vm0, %v810_v44 }
 0x33a   :  { %v833_v13 = vpop.f32.mrf.mxu0 }
 0x33b   :  { %1150 = vmatmul.msk.f32.vlgmr.msrb.gmra.mxu3 %vm63_vm0, %v833_v13 }
 0x342   :  { %v856_v46 = vpop.f32.mrf.mxu0 }
 0x343   :  { %1153 = vmatmul.msk.f32.vlgmr.msrb.gmra.mxu0 %vm63_vm0, %v856_v46 }
 0x347   :  { %v882_v47 = vpop.f32.mrf.mxu3 }
 0x348   :  { %v888_v48 = vadd.f32 %v1160_v40, %v882_v47 }
 0x358   :  { %v912_v20 = vpop.f32.mrf.mxu0 }
 0x359   :  { %v915_v18 = vadd.f32 %v912_v20, %v888_v48 }
 0x37e   :  { %v939_v22 = vpop.f32.mrf.mxu3 }
 0x37f   :  { %v942_v26 = vadd.f32 %v939_v22, %v915_v18 }
 0x392   :  { %v966_v23 = vpop.f32.mrf.mxu0 }
 0x393   :  { %v969_v28 = vadd.f32 %v966_v23, %v942_v26 }
 0x3be   :  { %v993_v49 = vpop.f32.mrf.mxu3 }
 0x3bf   :  { %v996_v50 = vadd.f32 %v993_v49, %v969_v28 }
 0x3c0   :  { %v1020_v51 = vpop.f32.mrf.mxu0 }
 0x3c1   :  { %v1023_v32 = vadd.f32 %v1020_v51, %v996_v50 }
 0x3c3   :  { %v1024_v52 = vmax.f32 %v1023_v32, 0.0 }
 0x3c5   :  { %1025 = vst [vmem:[#allocation2] sm:$0xff] %v1024_v52 }
 0x3c6   :  { %1036 = dma.vmem_to_hbm [thread:$0]  %s1032_s12, 128, %s1034_s14, [#allocation3]  }
 0x3c7   :  { %1209 = dma.done.wait [#allocation3], 128  }
 0x3c8   :  { %1210 = vsyncadd [#allocation3], 4294967168 }
 0x3c9   :  { %1041 = vsyncpa [#allocation3], 1 }

</bundles_post_ra>
